<compile_context>
chip_gen: v7x
topology: tpu7x:2x2x1
jax: 0.10.0
libtpu: 0.0.40
codegen_flags: <defaults>
</compile_context>

<pallas_src>
import functools

import jax
import jax.numpy as jnp
from jax.experimental import pallas as pl
from jax.experimental.pallas import tpu as pltpu

_LANE = 128


def _ceil_div(a, b):
    return -(-a // b)


def _round_up(a, m):
    return _ceil_div(a, m) * m


def _vmem_capacity_bytes():
    """Generation-aware VMEM capacity; falls back to 64 MiB (v7x per-TC, the
    smallest across v5e/v6e/v7x) so derived budgets are safe everywhere."""
    try:
        info = pltpu.get_tpu_info()
        for name in ("vmem_capacity_bytes", "vmem_size_bytes", "vmem_bytes"):
            v = getattr(info, name, None)
            if isinstance(v, int) and v > 0:
                return v
    except Exception:
        pass
    return 64 << 20


def _plan_tiling(HW, TC, itemsize, vmem_cap,
                 max_block_bytes=None, max_sub_bytes=None):
    """Pick (chunk, nc, sub, rows_pad).

    chunk : lanes per grid step (one double-buffered DMA block), multiple of
            128, sized to ~12-16 MiB (generation aware) per the perf review.
    nc    : number of full chunks along HW (the < chunk ragged tail is handled
            outside the kernel, so no zero-padding copy is ever needed).
    sub   : lanes per in-kernel static sub-slice; bounds the bf16->f32 upcast
            transient of one reduce step to <= ~4 MiB.
    """
    pack = 8 * max(1, 4 // max(1, itemsize))          # sublane packing of dtype
    rows_pad = _round_up(TC, pack)

    blk_budget = min(16 << 20, vmem_cap // 5)         # 12.8 MiB @64 MiB, 16 MiB @128 MiB
    if max_block_bytes is not None:
        blk_budget = min(blk_budget, max(max_block_bytes, rows_pad * itemsize * _LANE))
    sub_budget = 4 << 20
    if max_sub_bytes is not None:
        sub_budget = min(sub_budget, max(max_sub_bytes, rows_pad * 4 * _LANE))

    max_blk_lanes = max(_LANE, (blk_budget // (rows_pad * itemsize)) // _LANE * _LANE)
    max_sub_lanes = max(_LANE, (sub_budget // (rows_pad * 4)) // _LANE * _LANE)

    if HW < _LANE:
        chunk, nc = _LANE, 1                          # tiny corner case: pad to one block
    else:
        nc_t = _ceil_div(HW, max_blk_lanes)
        chunk = max(_LANE, ((HW // nc_t) // _LANE) * _LANE)
        nc = HW // chunk
    sub = min(chunk, max_sub_lanes)
    sub = max(sub, _round_up(_ceil_div(chunk, 16), _LANE))   # <= 16 static sub-slices
    return chunk, nc, sub, rows_pad


# ----------------------------------------------------------------------------
# Pallas kernel: one (batch row, HW chunk) per grid step.
#   v_ref    : (1, TC, chunk)  video chunk (bf16 or f32), pixel values in [0,1]
#   tail_ref : (1, TC, 1)      f32 pre-reduced ragged-tail sum (or zeros)
#   w1_ref   : (Dh, TC)        pooled-video projection (VMEM resident)
#   fb_ref   : (Dh, 1)         fused bias = Wq @ q_feat^T + b1 (query branch)
#   w2_ref   : (1, Dh)         output projection
#   b2_ref   : (1,)            output bias (SMEM scalar)
#   o_ref    : (1, 1, 128)     per-batch output block (logit broadcast on lanes)
#   acc_ref  : (TC, 1)         running f32 spatial sum for this batch row
# ----------------------------------------------------------------------------
def _disc_kernel(v_ref, tail_ref, w1_ref, fb_ref, w2_ref, b2_ref, o_ref,
                 acc_ref, *, inv_scale, sub):
    chunk = v_ref.shape[2]
    c = pl.program_id(1)

    @pl.when(c == 0)
    def _():
        # Initialise with the (XLA-computed) ragged-tail partial sum.
        acc_ref[...] = tail_ref[0]

    # Streaming spatial sum for this chunk, processed in static sub-slices so
    # the low-precision -> f32 upcast transient stays small.  The x*255 of
    # cotracker_forward is linear, so it is folded into `inv_scale` (applied
    # once to the pooled (TC, 1) feature) instead of a full-size multiply.
    partial = None
    col = 0
    while col < chunk:                                # static Python loop
        width = min(sub, chunk - col)
        sl = v_ref[0, :, col:col + width].astype(jnp.float32)   # (TC, width)
        p = jnp.sum(sl, axis=-1, keepdims=True)                  # (TC, 1)
        partial = p if partial is None else partial + p
        col += width
    acc_ref[...] += partial

    @pl.when(c == pl.num_programs(1) - 1)
    def _():
        v_feat = acc_ref[...] * inv_scale                        # mean * 255
        h = jnp.dot(w1_ref[...], v_feat,
                    preferred_element_type=jnp.float32)          # (Dh, 1)
        h = jnp.maximum(h + fb_ref[...], 0.0)
        logit = jnp.dot(w2_ref[...], h,
                        preferred_element_type=jnp.float32) + b2_ref[0]
        o_ref[...] = jnp.broadcast_to(logit.reshape(1, 1, 1), o_ref.shape)


# ----------------------------------------------------------------------------
# Query generation ('Grid' spatial + 'First' time), exact port of
# __queries_generate__ from the PyTorch module.
# ----------------------------------------------------------------------------
def generate_queries(B, T, H, W, max_num_queries):
    n = int(max_num_queries ** 0.5)
    center = [H / 2.0, W / 2.0]
    margin = W / 64.0
    range_y = (margin - H / 2.0 + center[0], H / 2.0 + center[0] - margin)
    range_x = (margin - W / 2.0 + center[1], W / 2.0 + center[1] - margin)
    gy = jnp.linspace(range_y[0], range_y[1], n)
    gx = jnp.linspace(range_x[0], range_x[1], n)
    grid_y, grid_x = jnp.meshgrid(gy, gx, indexing="ij")
    query_s = jnp.stack([grid_x, grid_y], axis=-1).reshape(1, -1, 2)   # [x, y]
    query_s = jnp.broadcast_to(query_s, (B, n * n, 2))
    query_t = jnp.zeros((B, n * n, 1), dtype=query_s.dtype)            # 'First'
    return jnp.concatenate([query_t, query_s], axis=-1)                # (B, N, 3)


# ----------------------------------------------------------------------------
# Parameters (deterministic, synthetic head).
# ----------------------------------------------------------------------------
def init_params(T, C, hidden=32, seed=1234):
    k = jax.random.PRNGKey(seed)
    k1, k2, k3, k4 = jax.random.split(k, 4)
    tc = T * C
    w1 = jax.random.normal(k1, (hidden, tc), jnp.float32) * 0.02
    wq = jax.random.normal(k2, (hidden, 3), jnp.float32) * 0.02
    b1 = jnp.zeros((hidden, 1), jnp.float32)
    w2 = jax.random.normal(k3, (1, hidden), jnp.float32) * 0.02
    b2 = jax.random.normal(k4, (1, 1), jnp.float32) * 0.02
    return w1, wq, b1, w2, b2


# ----------------------------------------------------------------------------
# Forward wrapper (g_step / d_step / pretrain all reduce to cotracker_forward;
# d_step's requires_grad/retain_grad bookkeeping is a JAX-transform concern).
# ----------------------------------------------------------------------------
def trajectory_discriminator_forward(forward_mode, vid, params,
                                     max_num_queries=16, real=True,
                                     compute_dtype=jnp.bfloat16,
                                     video_buffers=None,
                                     max_block_bytes=None, max_sub_bytes=None):
    """vid: (B, T, C, H, W) float in [0, 1]; returns cls_logits (B, 1)."""
    if forward_mode not in ("g_step", "d_step", "pretrain"):
        raise ValueError(f"Unsupported forward mode: {forward_mode}")

    B, T, C, H, W = vid.shape
    w1, wq, b1, w2, b2 = params
    Dh = w1.shape[0]
    TC, HW = T * C, H * W

    # Query branch hoisted out of the kernel: with 'Grid' spatial / 'First'
    # time queries every batch row gets the same query set, so its pooled
    # feature is a constant 3-vector -> fold the whole branch into one bias.
    queries = generate_queries(1, T, H, W, max_num_queries)               # (1,N,3)
    q_feat = jnp.mean(queries[0].astype(jnp.float32), axis=0, keepdims=True)
    fused_bias = (jnp.dot(wq, q_feat.T) + b1).astype(jnp.float32)         # (Dh,1)

    # Half-precision video stream (the PyTorch module runs CoTracker under an
    # fp16 autocast); halves the dominant HBM read.  Prefer feeding the
    # wrapper an already-bf16 video so the cast fuses upstream.
    compute_dtype = jnp.dtype(compute_dtype)
    vid_flat = vid.reshape(B, TC, HW).astype(compute_dtype)

    vmem_cap = _vmem_capacity_bytes()
    chunk, nc, sub, rows_pad = _plan_tiling(
        HW, TC, compute_dtype.itemsize, vmem_cap, max_block_bytes, max_sub_bytes)

    covered = nc * chunk
    if covered > HW:                      # only for HW < 128 (trivial pad)
        vid_flat = jnp.pad(vid_flat, ((0, 0), (0, 0), (0, covered - HW)))
        tail = 0
    else:
        tail = HW - covered
    if tail > 0:
        # Ragged tail (< one chunk) pre-reduced in XLA; avoids a full-array
        # zero-padding copy while keeping every in-kernel block full-size.
        tail_sum = jnp.sum(vid_flat[:, :, covered:].astype(jnp.float32),
                           axis=-1, keepdims=True)                       # (B,TC,1)
    else:
        tail_sum = jnp.zeros((B, TC, 1), jnp.float32)

    inv_scale = 255.0 / float(HW)         # fold x*255 into the spatial mean

    # VMEM budget: n_buf video blocks + f32 reduce transients + headroom,
    # clamped under physical capacity (64 MiB per TC on v7x).
    n_buf = 2 if video_buffers is None else int(video_buffers)
    blk_bytes = rows_pad * chunk * compute_dtype.itemsize
    sub_bytes = _round_up(TC, 8) * sub * 4
    vmem_limit = n_buf * blk_bytes + 2 * sub_bytes + (8 << 20)
    vmem_limit = max(32 << 20, vmem_limit)
    vmem_limit = min(vmem_limit, max(32 << 20, vmem_cap - (4 << 20)))

    vspec_kwargs = {}
    if video_buffers is not None and video_buffers != 2:
        vspec_kwargs["pipeline_mode"] = pl.Buffered(int(video_buffers))
    video_spec = pl.BlockSpec((1, TC, chunk), lambda b, c: (b, 0, c),
                              **vspec_kwargs)

    out = pl.pallas_call(
        functools.partial(_disc_kernel, inv_scale=inv_scale, sub=sub),
        out_shape=jax.ShapeDtypeStruct((B, 1, 128), jnp.float32),
        grid=(B, nc),
        in_specs=[
            video_spec,                                            # video chunk
            pl.BlockSpec((1, TC, 1), lambda b, c: (b, 0, 0)),      # tail sum
            pl.BlockSpec((Dh, TC), lambda b, c: (0, 0)),           # w1 (resident)
            pl.BlockSpec((Dh, 1), lambda b, c: (0, 0)),            # fused bias
            pl.BlockSpec((1, Dh), lambda b, c: (0, 0)),            # w2
            pl.BlockSpec(memory_space=pltpu.MemorySpace.SMEM),     # b2 scalar
        ],
        out_specs=pl.BlockSpec((1, 1, 128), lambda b, c: (b, 0, 0)),
        scratch_shapes=[pltpu.VMEM((TC, 1), jnp.float32)],
        compiler_params=pltpu.CompilerParams(
            dimension_semantics=("parallel", "arbitrary"),
            vmem_limit_bytes=int(vmem_limit)),
    )(vid_flat, tail_sum, w1.astype(jnp.float32), fused_bias,
      w2.astype(jnp.float32), b2.reshape(-1).astype(jnp.float32))

    return out[:, 0, :1]                              # (B, 1) cls_logits


# ----------------------------------------------------------------------------
# Pure-JAX reference (same math, un-fused) for a correctness check.
# ----------------------------------------------------------------------------
def reference_forward(vid, params, max_num_queries=16):
    B, T, C, H, W = vid.shape
    w1, wq, b1, w2, b2 = params
    x = vid.astype(jnp.float32) * 255.0
    v_feat = jnp.mean(x.reshape(B, T * C, H * W), axis=-1)          # (B, TC)
    queries = generate_queries(B, T, H, W, max_num_queries)
    q_feat = jnp.mean(queries.astype(jnp.float32), axis=1)          # (B, 3)
    h = jnp.maximum(v_feat @ w1.T + q_feat @ wq.T + b1.T, 0.0)      # (B, Dh)
    return h @ w2.T + b2.T                                          # (B, 1)


if __name__ == "__main__":
    # Small shapes consistent with the module's (B, T, C, H, W) convention.
    # H=W=50 makes H*W=2500 (not a multiple of 128) so the ragged-tail path
    # is exercised.
    B, T, C, H, W = 2, 8, 3, 50, 50
    MAX_Q = 16          # 4x4 query grid
    HIDDEN = 32

    key = jax.random.PRNGKey(0)
    vid = jax.random.uniform(key, (B, T, C, H, W), jnp.float32,
                             minval=0.0, maxval=1.0)     # pixel range [0, 1]
    # Half-precision video (matches the module's fp16 autocast; halves the
    # kernel's HBM read).  The reference is fed the same quantized video so
    # tolerances stay tight.
    vid_bf16 = vid.astype(jnp.bfloat16)
    params = init_params(T, C, hidden=HIDDEN)
    ref = reference_forward(vid_bf16, params, max_num_queries=MAX_Q)

    # Small block / sub budgets force the multi-chunk grid, the multi-sub
    # in-kernel loop and the ragged-tail init at toy shapes, so every
    # production code path is exercised.
    cls_logits = trajectory_discriminator_forward(
        "pretrain", vid_bf16, params, max_num_queries=MAX_Q,
        max_block_bytes=32 * 1024, max_sub_bytes=8 * 1024)
    cls_logits = jax.block_until_ready(cls_logits)

    assert cls_logits.shape == (B, 1), cls_logits.shape
    assert cls_logits.dtype == jnp.float32
    assert bool(jnp.all(jnp.isfinite(cls_logits)))
    assert bool(jnp.allclose(cls_logits, ref, rtol=2e-3, atol=2e-3)), (
        cls_logits, ref)

    # Also run the default (production) tiling path once.
    cls_logits2 = jax.block_until_ready(
        trajectory_discriminator_forward("g_step", vid_bf16, params,
                                         max_num_queries=MAX_Q))
    assert bool(jnp.allclose(cls_logits2, ref, rtol=2e-3, atol=2e-3)), (
        cls_logits2, ref)

    print("KERNEL_OK")
</pallas_src>

<mosaic_0001>
module attributes {stable_mosaic.version = 11 : i64} {
  func.func @_disc_kernel(%arg0: i32, %arg1: i32, %arg2: memref<1x24x384xbf16, #tpu.memory_space<vmem>>, %arg3: memref<1x24x1xf32, #tpu.memory_space<vmem>>, %arg4: memref<32x24xf32, #tpu.memory_space<vmem>>, %arg5: memref<32x1xf32, #tpu.memory_space<vmem>>, %arg6: memref<1x32xf32, #tpu.memory_space<vmem>>, %arg7: memref<1xf32, #tpu.memory_space<smem>>, %arg8: memref<1x1x128xf32, #tpu.memory_space<vmem>>, %arg9: memref<24x1xf32, #tpu.memory_space<vmem>>) attributes {dimension_semantics = [#tpu.dimension_semantics<parallel>, #tpu.dimension_semantics<arbitrary>], iteration_bounds = array<i64: 2, 6>, scalar_prefetch = 0 : i64, scratch_operands = 1 : i64, tpu.core_type = #tpu.core_type<tc>, window_params = [{transform_indices = @transform_0, window_bounds = array<i64: 1, 24, 384>}, {transform_indices = @transform_1, window_bounds = array<i64: 1, 24, 1>}, {pipeline_mode = #tpu.pipeline_mode<synchronous>, transform_indices = @transform_2, window_bounds = array<i64: 32, 24>}, {pipeline_mode = #tpu.pipeline_mode<synchronous>, transform_indices = @transform_3, window_bounds = array<i64: 32, 1>}, {pipeline_mode = #tpu.pipeline_mode<synchronous>, transform_indices = @transform_4, window_bounds = array<i64: 1, 32>}, {transform_indices = @transform_5, window_bounds = array<i64: 1>}, {transform_indices = @transform_6, window_bounds = array<i64: 1, 1, 128>}]} {
    %c0_i32 = arith.constant 0 : i32
    %0 = arith.cmpi eq, %arg1, %c0_i32 : i32
    %1 = arith.extui %0 : i1 to i32
    %c0_i32_0 = arith.constant 0 : i32
    %2 = arith.cmpi ne, %1, %c0_i32_0 : i32
    scf.if %2 {
      %c0_14 = arith.constant 0 : index
      %c0_15 = arith.constant 0 : index
      %c0_16 = arith.constant 0 : index
      %26 = vector.load %arg3[%c0_14, %c0_15, %c0_16] : memref<1x24x1xf32, #tpu.memory_space<vmem>>, vector<1x24x1xf32>
      %27 = vector.shape_cast %26 : vector<1x24x1xf32> to vector<24x1xf32>
      %c0_17 = arith.constant 0 : index
      %c0_18 = arith.constant 0 : index
      %28 = vector.load %arg9[%c0_17, %c0_18] : memref<24x1xf32, #tpu.memory_space<vmem>>, vector<24x1xf32>
      tpu.vector_store %arg9[%c0_17, %c0_18], %27 {strides = array<i32>} : memref<24x1xf32, #tpu.memory_space<vmem>>, vector<24x1xf32>,
    } else {
    }
    %c0 = arith.constant 0 : index
    %c0_1 = arith.constant 0 : index
    %c0_2 = arith.constant 0 : index
    %3 = vector.load %arg2[%c0, %c0_1, %c0_2] : memref<1x24x384xbf16, #tpu.memory_space<vmem>>, vector<1x24x128xbf16>
    %4 = vector.shape_cast %3 : vector<1x24x128xbf16> to vector<24x128xbf16>
    %5 = arith.extf %4 : vector<24x128xbf16> to vector<24x128xf32>
    %cst = arith.constant dense<0.000000e+00> : vector<24xf32>
    %6 = vector.multi_reduction <add>, %5, %cst [1] : vector<24x128xf32> to vector<24xf32>
    %7 = vector.shape_cast %6 : vector<24xf32> to vector<24x1xf32>
    %c0_3 = arith.constant 0 : index
    %c0_4 = arith.constant 0 : index
    %c128 = arith.constant 128 : index
    %8 = vector.load %arg2[%c0_3, %c0_4, %c128] : memref<1x24x384xbf16, #tpu.memory_space<vmem>>, vector<1x24x128xbf16>
    %9 = vector.shape_cast %8 : vector<1x24x128xbf16> to vector<24x128xbf16>
    %10 = arith.extf %9 : vector<24x128xbf16> to vector<24x128xf32>
    %cst_5 = arith.constant dense<0.000000e+00> : vector<24xf32>
    %11 = vector.multi_reduction <add>, %10, %cst_5 [1] : vector<24x128xf32> to vector<24xf32>
    %12 = vector.shape_cast %11 : vector<24xf32> to vector<24x1xf32>
    %13 = arith.addf %7, %12 : vector<24x1xf32>
    %c0_6 = arith.constant 0 : index
    %c0_7 = arith.constant 0 : index
    %c256 = arith.constant 256 : index
    %14 = vector.load %arg2[%c0_6, %c0_7, %c256] : memref<1x24x384xbf16, #tpu.memory_space<vmem>>, vector<1x24x128xbf16>
    %15 = vector.shape_cast %14 : vector<1x24x128xbf16> to vector<24x128xbf16>
    %16 = arith.extf %15 : vector<24x128xbf16> to vector<24x128xf32>
    %cst_8 = arith.constant dense<0.000000e+00> : vector<24xf32>
    %17 = vector.multi_reduction <add>, %16, %cst_8 [1] : vector<24x128xf32> to vector<24xf32>
    %18 = vector.shape_cast %17 : vector<24xf32> to vector<24x1xf32>
    %19 = arith.addf %13, %18 : vector<24x1xf32>
    %c0_9 = arith.constant 0 : index
    %c0_10 = arith.constant 0 : index
    %20 = vector.load %arg9[%c0_9, %c0_10] : memref<24x1xf32, #tpu.memory_space<vmem>>, vector<24x1xf32>
    %21 = arith.addf %20, %19 : vector<24x1xf32>
    %c0_11 = arith.constant 0 : index
    %c0_12 = arith.constant 0 : index
    %22 = vector.load %arg9[%c0_11, %c0_12] : memref<24x1xf32, #tpu.memory_space<vmem>>, vector<24x1xf32>
    tpu.vector_store %arg9[%c0_11, %c0_12], %21 {strides = array<i32>} : memref<24x1xf32, #tpu.memory_space<vmem>>, vector<24x1xf32>,
    %c5_i32 = arith.constant 5 : i32
    %23 = arith.cmpi eq, %arg1, %c5_i32 : i32
    %24 = arith.extui %23 : i1 to i32
    %c0_i32_13 = arith.constant 0 : i32
    %25 = arith.cmpi ne, %24, %c0_i32_13 : i32
    scf.if %25 {
      %c0_14 = arith.constant 0 : index
      %c0_15 = arith.constant 0 : index
      %26 = vector.load %arg9[%c0_14, %c0_15] : memref<24x1xf32, #tpu.memory_space<vmem>>, vector<24x1xf32>
      %cst_16 = arith.constant 1.020000e-01 : f32
      %27 = vector.broadcast %cst_16 : f32 to vector<24x1xf32>
      %28 = arith.mulf %26, %27 : vector<24x1xf32>
      %c0_17 = arith.constant 0 : index
      %c0_18 = arith.constant 0 : index
      %29 = vector.load %arg4[%c0_17, %c0_18] : memref<32x24xf32, #tpu.memory_space<vmem>>, vector<32x24xf32>
      %cst_19 = arith.constant dense<0.000000e+00> : vector<32x1xf32>
      %30 = tpu.matmul %29, %28, %cst_19 {dimension_numbers = #tpu.dot_dimension_numbers<[1], [0], [0], [1], [0, 0, 1, 1], [], []>} : vector<32x24xf32>, vector<24x1xf32>, vector<32x1xf32> -> vector<32x1xf32>
      %c0_20 = arith.constant 0 : index
      %c0_21 = arith.constant 0 : index
      %31 = vector.load %arg5[%c0_20, %c0_21] : memref<32x1xf32, #tpu.memory_space<vmem>>, vector<32x1xf32>
      %32 = arith.addf %30, %31 : vector<32x1xf32>
      %cst_22 = arith.constant 0.000000e+00 : f32
      %33 = vector.broadcast %cst_22 : f32 to vector<32x1xf32>
      %34 = arith.maximumf %32, %33 : vector<32x1xf32>
      %c0_23 = arith.constant 0 : index
      %c0_24 = arith.constant 0 : index
      %35 = vector.load %arg6[%c0_23, %c0_24] : memref<1x32xf32, #tpu.memory_space<vmem>>, vector<1x32xf32>
      %cst_25 = arith.constant dense<0.000000e+00> : vector<1x1xf32>
      %36 = tpu.matmul %35, %34, %cst_25 {dimension_numbers = #tpu.dot_dimension_numbers<[1], [0], [0], [1], [0, 0, 1, 1], [], []>} : vector<1x32xf32>, vector<32x1xf32>, vector<1x1xf32> -> vector<1x1xf32>
      %c0_26 = arith.constant 0 : index
      %37 = memref.load %arg7[%c0_26] : memref<1xf32, #tpu.memory_space<smem>>
      %38 = vector.broadcast %37 : f32 to vector<1x1xf32>
      %39 = arith.addf %36, %38 : vector<1x1xf32>
      %40 = vector.shape_cast %39 : vector<1x1xf32> to vector<1x1x1xf32>
      %41 = vector.shape_cast %40 : vector<1x1x1xf32> to vector<1x1x1xf32>
      %42 = vector.broadcast %41 : vector<1x1x1xf32> to vector<1x1x128xf32>
      %c0_27 = arith.constant 0 : index
      %c0_28 = arith.constant 0 : index
      %c0_29 = arith.constant 0 : index
      %43 = vector.load %arg8[%c0_27, %c0_28, %c0_29] : memref<1x1x128xf32, #tpu.memory_space<vmem>>, vector<1x1x128xf32>
      tpu.vector_store %arg8[%c0_27, %c0_28, %c0_29], %42 {strides = array<i32>} : memref<1x1x128xf32, #tpu.memory_space<vmem>>, vector<1x1x128xf32>,
    } else {
    }
    return
  }
  func.func @transform_0(%arg0: i32, %arg1: i32) -> (i32, i32, i32) {
    %c0_i32 = arith.constant 0 : i32
    %c0_i32_0 = arith.constant 0 : i32
    return %arg0, %c0_i32, %arg1 : i32, i32, i32
  }
  func.func @transform_1(%arg0: i32, %arg1: i32) -> (i32, i32, i32) {
    %c0_i32 = arith.constant 0 : i32
    %c0_i32_0 = arith.constant 0 : i32
    %c0_i32_1 = arith.constant 0 : i32
    return %arg0, %c0_i32, %c0_i32_0 : i32, i32, i32
  }
  func.func @transform_2(%arg0: i32, %arg1: i32) -> (i32, i32) {
    %c0_i32 = arith.constant 0 : i32
    %c0_i32_0 = arith.constant 0 : i32
    %c0_i32_1 = arith.constant 0 : i32
    return %c0_i32, %c0_i32_0 : i32, i32
  }
  func.func @transform_3(%arg0: i32, %arg1: i32) -> (i32, i32) {
    %c0_i32 = arith.constant 0 : i32
    %c0_i32_0 = arith.constant 0 : i32
    %c0_i32_1 = arith.constant 0 : i32
    return %c0_i32, %c0_i32_0 : i32, i32
  }
  func.func @transform_4(%arg0: i32, %arg1: i32) -> (i32, i32) {
    %c0_i32 = arith.constant 0 : i32
    %c0_i32_0 = arith.constant 0 : i32
    %c0_i32_1 = arith.constant 0 : i32
    return %c0_i32, %c0_i32_0 : i32, i32
  }
  func.func @transform_5(%arg0: i32, %arg1: i32) -> i32 {
    %c0_i32 = arith.constant 0 : i32
    %c0_i32_0 = arith.constant 0 : i32
    return %c0_i32 : i32
  }
  func.func @transform_6(%arg0: i32, %arg1: i32) -> (i32, i32, i32) {
    %c0_i32 = arith.constant 0 : i32
    %c0_i32_0 = arith.constant 0 : i32
    %c0_i32_1 = arith.constant 0 : i32
    return %arg0, %c0_i32, %c0_i32_0 : i32, i32, i32
  }
}

</mosaic_0001>

<bundles_post_ra>
// kernel: tpu_custom_call.1
= control target key start
LH: loop header
LB: loop body
LE: loop exit
PB: predicated region body
PF: predicated region fallthrough
CT: control target
= control target key end

     0   :  { %s1313_s0 = inlined_call_operand.hbm [shape: bf16[2,24,2500], index: 0, kind: input, shape index: {}]   ;;  %s1314_s1 = inlined_call_operand.vmem [shape: f32[2,24,1], index: 1, kind: input, shape index: {}]   ;;  %s1315_s2 = inlined_call_operand.vmem [shape: f32[32,24], index: 2, kind: input, shape index: {}]   ;;  %s1316_s3 = inlined_call_operand.vmem [shape: f32[32,1], index: 3, kind: input, shape index: {}]   ;;  %s1317_s4 = inlined_call_operand.vmem [shape: f32[1,32], index: 4, kind: input, shape index: {}]   ;;  %s1318_s5 = inlined_call_operand.<no memory space> [shape: f32[1], index: 5, kind: input, shape index: {}]   ;;  %s1319_s6 = inlined_call_operand.hbm [shape: f32[2,1,128], index: 6, kind: output, shape index: {}]  }
   0x1   :  { %11 = sst [smem:[#allocation3]] %s1318_s5 }
   0x2   :  { %12 = vsyncpa [#allocation5], 0 }
   0x3   :  { %14 = vsyncpa [#allocation5 + $0x1], 0 }
   0x4   :  { %15 = vsyncpa [#allocation6], 0 }
   0x5   :  { %17 = vsyncpa [#allocation6 + $0x1], 0  ;;  %s1063_s23 = smov 0   ;;  %s1065_s24 = smov 0  }
   0x6   :  { %s1067_s25 = smov 0   ;;  %s1069_s26 = smov 0  }
   0x7   :  { %s1071_s27 = smov 0   ;;  %s1073_s28 = smov 0  }
   0x8   :  { %s1075_s29 = smov 0   ;;  %s1077_s30 = smov 0  }
   0x9   :  { %s1079_s5 = smov 0   ;;  %s1081_s7 = smov 0  }
   0xa   :  { %s1083_s8 = smov 0  }
   0xb LB: > { %1324 = sst [smem:[#allocation10_spill]] %s994_s28  ;;  %s689_s9 = sadd.s32 4294967295, %s1014_s8   ;;  %s1014_s8 = sphi %s1083_s8, %s23_s8   ;;  %s1010_s7 = sphi %s1081_s7, %s1347_s7   ;;  %s1006_s5 = sphi %s1079_s5, %s1339_s5   ;;  %s1002_s30 = sphi %s1077_s30, %s1346_s30   ;;  %s998_s29 = sphi %s1075_s29, %s1338_s29   ;;  %s994_s28 = sphi %s1073_s28, %s1337_s28   ;;  %s990_s27 = sphi %s1071_s27, %s1345_s27   ;;  %s986_s26 = sphi %s1069_s26, %s1344_s26   ;;  %s982_s25 = sphi %s1067_s25, %s1343_s25   ;;  %s978_s24 = sphi %s1065_s24, %s1342_s24   ;;  %s974_s23 = sphi %s1063_s23, %s1341_s23  }
   0xc   : > { %1325 = sst [smem:[#allocation11_spill]] %s1006_s5  ;;  %s690_s10 = sadd.s32 4294967294, %s1014_s8  }
   0xd   : > { %s32_s11 = sadd.s32 1, %s1006_s5  ;;  %s35_s12 = sadd.s32 1, %s1010_s7 }
   0xe   : > { %p33_p0 = scmp.ge.s32.totalorder %s32_s11, 6  ;;  %s44_s13 = sadd.s32 1, %s994_s28 }
   0xf   : > { %p51_p1 = scmp.ne.s32.totalorder %s994_s28, %s990_s27  ;;  %p52_p2 = scmp.eq.s32.totalorder %s1014_s8, 0 }
  0x10   : > { %s1349_s11 = smov (%p33_p0, %s32_s11), 0  ;;  %s1351_s12 = smov (!%p33_p0, %s35_s12), %s1010_s7 }
  0x11   : > { %1326 = sst [smem:[#allocation12_spill]] %s1349_s11  ;;  %s40_s14 = ssub.s32 %s1006_s5, %s1349_s11 }
  0x12   : > { %p1129_p3 = por %p52_p2, %p51_p1  ;;  %p37_p4 = scmp.ge.s32.totalorder %s1351_s12, 2 }
  0x13   : > { %p57_p5 = scmp.ne.s32.totalorder %s990_s27, %s986_s26  ;;  %p58_p6 = scmp.eq.s32.totalorder %s689_s9, 0 }
  0x14   : > { %s180_s16 = sadd.s32 1, %s982_s25  ;;  %s1353_s12 = smov (%p37_p4, %s1351_s12), 0 }
  0x15   : > { %1328 = sst [smem:[#allocation13_spill]] %s1353_s12  ;;  %p1137_p7 = por %p58_p6, %p57_p5 }
  0x16   : > { %p190_p8 = scmp.ne.s32.totalorder %s982_s25, %s978_s24  ;;  %s39_s18 = ssub.s32 %s1010_s7, %s1353_s12 }
  0x17   : > { %p191_p9 = scmp.eq.s32.totalorder %s689_s9, 11  ;;  %s41_s19 = sor.u32 %s40_s14, %s39_s18 }
  0x18   : > { %p178_p10 = scmp.eq.s32.totalorder %s39_s18, 0  ;;  %p42_p11 = scmp.eq.s32.totalorder %s41_s19, 0 }
  0x19   : > { %p1145_p12 = por %p191_p9, %p190_p8  ;;  %p196_p13 = scmp.ne.s32.totalorder %s978_s24, %s974_s23 }
  0x1a   : > { %s1150_s21 = scalar_select %p178_p10, %s982_s25, %s180_s16  }
  0x1b   : > { %s1153_s22 = scalar_select %p42_p11, %s994_s28, %s44_s13  }
  0x1c   : > { %1331 = sst [smem:[#allocation14_spill]] %s1150_s21  ;;  %p197_p0 = scmp.eq.s32.totalorder %s690_s10, 11 }
  0x1d   : > { %1332 = sst [smem:[#allocation15_spill]] %s1153_s22  ;;  %p692_p2 = scmp.ge.s32.totalorder %s1014_s8, 12 }
  0x1e   : > { %p1157_p1 = por %p197_p0, %p196_p13 }
  0x1f   : > { %225 = sbr.rel (%p692_p2) target bundleno = 69 (0x45), region = 32 }
  0x20   : > { %s1333_s26 = scalar_select %p1157_p1, 1, 0 }
  0x26   : > { %228 = sbr.rel (!%p1129_p3) target bundleno = 69 (0x45), region = 36  ;;  %s229_s9 = sand.u32 (%p1129_p3), 1, %s994_s28  }
  0x27   : > { %s234_s14 = smul.u32 (%p1129_p3), 3, %s1006_s5  ;;  %s1166_s13 = scalar_lea.sflag (%p1129_p3), [#allocation5], %s229_s9 }
  0x28   : > { %s755_s16 = smul.u32 (%p1129_p3), 36, %s229_s9 }
  0x29   : > { %s756_s10 = smul.u32 (%p1129_p3), 60, %s1010_s7 }
  0x2a   : > { %s233_s18 = scalar_lea.vmem (%p1129_p3), [#allocation4], %s755_s16  ;;  %s866_s16 = scalar_lea.hbm (%p1129_p3), %s1313_s0, 7680 }
  0x2b   : > { %s249_s19 = sshll.u32 (%p1129_p3), %s233_s18, 4  ;;  %s244_s12 = sadd.s32 (%p1129_p3), %s756_s10, %s234_s14  ;;  %s1169_s19 = int_to_ptr.vmem [resolvable:$true] %s249_s19 }
  0x2c   : > { %s694_s11 = sshll.u32 (%p1129_p3), %s244_s12, 6 }
  0x2d   : > { %s1174_s15 = scalar_lea.hbm %s1313_s0, %s694_s11 }
  0x2e   : > { %s862_s5 = scalar_lea.hbm %s1174_s15, 576  ;;  %p867_p4 = scmp.lt.u32.totalorder %s1174_s15, %s1313_s0 }
  0x2f   : > { %p863_p3 = scmp.ne.s32.totalorder %s1174_s15, %s862_s5  ;;  %p868_p5 = scmp.lt.u32.totalorder %s866_s16, %s862_s5 }
  0x30   : > { %p870_p8 = scmp.lt.u32.totalorder %s862_s5, %s1174_s15 }
  0x31   : > { %p869_p6 = por %p868_p5, %p867_p4 }
  0x33   : > { %p871_p9 = por %p870_p8, %p869_p6 }
  0x35   : > { %p872_p10 = pnand %p871_p9, %p863_p3 }
  0x37   : > { %875 = shalt.err (!%p872_p10)
}
  0x38   : > { %s876_s11 = scalar_lea.vmem %s1169_s19, 576  ;;  %s1016_s12 = smov [#allocation4]  }
  0x39   : > { %p877_p11 = scmp.ne.s32.totalorder %s1169_s19, %s876_s11  ;;  %s880_s21 = sshll.u32 %s1016_s12, 4  ;;  %s881_s21 = int_to_ptr.vmem [resolvable:$false] %s880_s21 }
  0x3a   : > { %s882_s28 = scalar_lea.vmem %s881_s21, 1152  ;;  %p883_p13 = scmp.lt.s32.totalorder %s1169_s19, %s881_s21 }
  0x3b   : > { %p884_p0 = scmp.lt.s32.totalorder %s882_s28, %s876_s11 }
  0x3d   : > { %p885_p2 = por %p884_p0, %p883_p13 }
  0x3f   : > { %p886_p1 = pnand %p885_p2, %p877_p11 }
  0x41   : > { %889 = shalt.err (!%p886_p1)
}
  0x42   : > { %s1017_s22 = smov 1280   ;;  %s1018_s5 = smov 192  }
  0x43   : > { %s1019_s10 = smov 12  }
  0x44   : > { %255 = dma.hbm_to_vmem [thread:$0]  %s1174_s15, 576, %s1169_s19, %s1166_s13, %s1017_s22, %s1018_s5, %s1019_s10  }
  0x45 PF: > { %p698_p3 = scmp.ge.s32.totalorder %s1014_s8, 1  ;;  %p265_p4 = scmp.lt.s32.totalorder %s1014_s8, 13 }
  0x47   : > { %p266_p5 = pnand %p698_p3, %p265_p4 }
  0x48   : > { %s271_s9 = sand.u32 (!%p266_p5), 1, %s990_s27  }
  0x49   : > { %269 = sbr.rel (%p266_p5) target bundleno = 863 (0x35f), region = 44  ;;  %s272_s18 = scalar_lea.sflag (!%p266_p5), [#allocation5], %s271_s9 }
  0x4a   : > { %s757_s16 = smul.u32 (!%p266_p5), 36, %s271_s9 }
  0x4c   : > { %s1195_s14 = scalar_lea.vmem (!%p266_p5), [#allocation4], %s757_s16 }
  0x50   : > { %963 = dma.done.wait (%p1137_p7), %s272_s18, 576  }
  0x51   : > { %965 = vsyncadd (%p1137_p7), %s272_s18, 4294966720  ;;  %s306_s13 = sand.u32 1, %s978_s24   ;;  %p313_p1 = scmp.lt.s32.totalorder %s1002_s30, 1 }
  0x52   : > { %s1209_s28 = scalar_lea.vmem [#allocation7], %s306_s13  ;;  %p700_p6 = scmp.ne.s32.totalorder %s998_s29, 0 }
  0x53   : > { %s314_s19 = scalar_select %p313_p1, %s1002_s30, 1 }
  0x54   : > { %321 = sbr.rel (%p700_p6) target bundleno = 91 (0x5b), region = 52  ;;  %vm325_vm0 = vcmask (!%p700_p6), 7168  }
  0x55   : > { %s758_s15 = smul.u32 24, %s314_s19 }
  0x57   : > { %s317_s21 = scalar_lea.vmem %s1314_s1, %s758_s15 }
  0x58   : > { %v322_v0 = vld [vmem:[%s317_s21] sm:$0xff] (!%p700_p6)  ;;  %v323_v1 = vld [vmem:[%s317_s21 + $0x8] sm:$0xff] (!%p700_p6)  ;;  %v324_v2 = vld [vmem:[%s317_s21 + $0x10] sm:$0xff] (!%p700_p6) }
  0x59   : > { %326 = vst.msk [vmem:[#allocation2] sm:$0xff] (!%p700_p6), %vm325_vm0, %v322_v0  ;;  %327 = vst.msk [vmem:[#allocation2 + $0x8] sm:$0xff] (!%p700_p6), %vm325_vm0, %v323_v1 }
  0x5a   : > { %328 = vst.msk [vmem:[#allocation2 + $0x10] sm:$0xff] (!%p700_p6), %vm325_vm0, %v324_v2 }
  0x5b PF: > { %v331_v3 = vld [vmem:[%s1195_s14 + $0x18] sm:$0xff]   ;;  %v329_v4 = vld [vmem:[%s1195_s14] sm:$0xff]   ;;  %v330_v5 = vld [vmem:[%s1195_s14 + $0xc] sm:$0xff]   ;;  %vm377_vm1 = vcmask 7168   ;;  %p701_p7 = scmp.ne.s32.totalorder %s998_s29, 5 }
  0x5c   : > { %v334_v6 = vunpack.c.l.bf16 %v331_v3  ;;  %v332_v7 = vunpack.c.l.bf16 %v329_v4  ;;  %v344_v8 = vunpack.c.h.bf16 %v329_v4  ;;  %v333_v9 = vunpack.c.l.bf16 %v330_v5  ;;  %v357_v12 = vld [vmem:[%s1195_s14 + $0x8] ss:$12 sps:$4 sm:$0xff]   ;;  %v358_v15 = vld [vmem:[%s1195_s14 + $0x20] sm:$0xf]  ;;  %s502_s10 = sld [smem:[#allocation3]] (!%p701_p7) }
  0x5d   : > { %v346_v10 = vunpack.c.h.bf16 %v331_v3  ;;  %v345_v11 = vunpack.c.h.bf16 %v330_v5  ;;  %v360_v13 = vunpack.c.h.bf16 %v357_v12  ;;  %v359_v14 = vunpack.c.l.bf16 %v357_v12  ;;  %v391_v43 = vld [vmem:[%s1315_s2] sm:$0xff] (!%p701_p7)  ;;  %v392_v46 = vld [vmem:[%s1315_s2 + $0x8] sm:$0xff] (!%p701_p7)  ;;  %v393_v47 = vld [vmem:[%s1315_s2 + $0x10] sm:$0xff] (!%p701_p7) }
  0x5e   : > { %339 = vadd.xlane.f32.xlu1 %v334_v6  ;;  %335 = vadd.xlane.f32.xlu0 %v332_v7  ;;  %v361_v16 = vunpack.c.l.bf16 %v358_v15  ;;  %vm399_vm2 = vcmask (!%p701_p7), 195584   ;;  %v394_v48 = vld [vmem:[%s1315_s2 + $0x18] sm:$0xff] (!%p701_p7)  ;;  %v1020_v49 = vmov (!%p701_p7), 0.0|0.0   ;;  %vm1021_vm3 = vmmov (!%p701_p7), 0   ;;  %v396_v51 = vld [vmem:[%s1316_s3 + $0x8] sm:$0xff] (!%p701_p7)  ;;  %v395_v52 = vld [vmem:[%s1316_s3] sm:$0xff] (!%p701_p7) }
  0x5f   : > { %728 = vmatprep.mubr.msk.f32.mxu0 (!%p701_p7), %vm399_vm2, %v391_v43  ;;  %749 = vmatprep.subr.bf16.mxu1 (!%p701_p7), %v1020_v49  ;;  %v1022_v50 = vmov (!%p701_p7), 0.0   ;;  %v398_v57 = vld [vmem:[%s1316_s3 + $0x18] sm:$0xff] (!%p701_p7)  ;;  %v397_v59 = vld [vmem:[%s1316_s3 + $0x10] sm:$0xff] (!%p701_p7)  ;;  %v501_v5 = vld [vmem:[%s1317_s4] sm:$0x1] (!%p701_p7)  ;;  %vm504_vm4 = vcmask (!%p701_p7), 261120  }
  0x60   : > { %v372_v25 = vld [vmem:[#allocation2 + $0x8] sm:$0xff]  ;;  %v371_v27 = vld [vmem:[#allocation2] sm:$0xff]  ;;  %742 = vmatprep.mubr.msk.f32.mxu1 (!%p701_p7), %vm1021_vm3, %v1022_v50  ;;  %v1023_v6 = vmov (!%p701_p7), 0  }
  0x61   : > { %v373_v34 = vld [vmem:[#allocation2 + $0x10] sm:$0xff]  ;;  %861 = vset.pattern.permute.xlu0 (!%p701_p7), %v1023_v6 }
  0x62   : > { %347 = vadd.xlane.f32.xlu1 %v344_v8  ;;  %337 = vadd.xlane.f32.xlu0 %v333_v9  ;;  %v503_v7 = vstv (!%p701_p7), %s502_s10 }
  0x66   : > { %351 = vadd.xlane.f32.xlu1 %v346_v10  ;;  %349 = vadd.xlane.f32.xlu0 %v345_v11 }
  0x6a   : > { %364 = vadd.xlane.f32.xlu1 %v360_v13  ;;  %362 = vadd.xlane.f32.xlu0 %v359_v14 }
  0x6e   : > { %366 = vadd.xlane.f32.xlu0 %v361_v16 }
  0xeb   : > { %v340_v17 = vpop.xlane.xlu1 %339  ;;  %v336_v18 = vpop.xlane.xlu0 %335 }
  0xef   : > { %v348_v19 = vpop.xlane.xlu1 %347  ;;  %v338_v20 = vpop.xlane.xlu0 %337 }
  0xf0   : > { %v353_v23 = vadd.f32 %v348_v19, %v336_v18 }
  0xf3   : > { %v352_v21 = vpop.xlane.xlu1 %351  ;;  %v350_v22 = vpop.xlane.xlu0 %349 }
  0xf4   : > { %v354_v24 = vadd.f32 %v350_v22, %v338_v20  ;;  %v355_v31 = vadd.f32 %v352_v21, %v340_v17 }
  0xf7   : > { %v365_v26 = vpop.xlane.xlu1 %364  ;;  %v363_v28 = vpop.xlane.xlu0 %362 }
  0xf8   : > { %v369_v29 = vadd.f32 %v365_v26, %v354_v24  ;;  %v368_v30 = vadd.f32 %v363_v28, %v353_v23 }
  0xfa   : > { %v375_v32 = vadd.f32 %v372_v25, %v369_v29  ;;  %v374_v33 = vadd.f32 %v371_v27, %v368_v30  ;;  %384 = sbr.rel (%p701_p7) target bundleno = 839 (0x347), region = 56 }
  0xfb   : > { %v367_v35 = vpop.xlane.xlu0 %366 }
  0xfc   : > { %379 = vst.msk [vmem:[#allocation2 + $0x8] sm:$0xff] %vm377_vm1, %v375_v32  ;;  %378 = vst.msk [vmem:[#allocation2] sm:$0xff] %vm377_vm1, %v374_v33  ;;  %v370_v36 = vadd.f32 %v367_v35, %v355_v31 }
  0xfe   : > { %v376_v37 = vadd.f32 %v373_v34, %v370_v36 }
 0x100   : > { %380 = vst.msk [vmem:[#allocation2 + $0x10] sm:$0xff] %vm377_vm1, %v376_v37 }
 0x103   : > { %v385_v38 = vld [vmem:[#allocation2] sm:$0xff]  ;;  %v386_v39 = vld [vmem:[#allocation2 + $0x8] sm:$0xff] }
 0x104   : > { %v388_v41 = vmul.f32 0.102, %v385_v38  ;;  %v389_v42 = vmul.f32 0.102, %v386_v39 }
 0x106   : > { %v745_v44 = vpack.c.bf16 %v389_v42, %v388_v41 }
 0x107   : > { %v387_v40 = vld [vmem:[#allocation2 + $0x10] sm:$0xff] }
 0x108   : > { %v390_v45 = vmul.f32 0.102, %v387_v40  ;;  %746 = vmatprep.subr.bf16.mxu0 %v745_v44 }
 0x109   : > { %748 = vmatpush3.bf16.msra.mxu0 %v745_v44 }
 0x10a   : > { %726 = vmatprep.subr.mxu0 %v390_v45 }
 0x10d   : > { %727 = vmatpush3.msra.mxu0 %v390_v45 }
 0x10e   : > { %729 = vmatmul.mubr.msk.f32.vlgmr.msra.gmra.mrb[0].mxu0 %vm399_vm2, %v392_v46 }
 0x10f   : > { %731 = vmatprep.mubr.msk.f32.mxu0 %vm399_vm2, %v393_v47 }
 0x112   : > { %732 = vmatmul.mubr.msk.f32.gmra.mrb[2].mxu0 %vm399_vm2, %v394_v48 }
 0x1e1   : > { %v730_v53 = vpop.f32.mrb[0].mxu0 }
 0x1e2   : > { %v484_v54 = vadd.f32 %v730_v53, %v396_v51  ;;  %v478_v55 = vpop.f32.mrb[1].mxu0 }
 0x1e3   : > { %v479_v56 = vadd.f32 %v478_v55, %v395_v52 }
 0x1e4   : > { %v498_v58 = vmax.f32 %v484_v54, 0.0 }
 0x1e5   : > { %v497_v60 = vmax.f32 %v479_v56, 0.0  ;;  %v733_v61 = vpop.f32.mrb[2].mxu0 }
 0x1e6   : > { %v494_v62 = vadd.f32 %v733_v61, %v398_v57  ;;  %v488_v63 = vpop.f32.mrb[3].mxu0 }
 0x1e7   : > { %v489_v0 = vadd.f32 %v488_v63, %v397_v59  ;;  %v750_v1 = vpack.c.bf16 %v498_v58, %v497_v60 }
 0x1e8   : > { %v500_v2 = vmax.f32 %v494_v62, 0.0 }
 0x1e9   : > { %v499_v3 = vmax.f32 %v489_v0, 0.0  ;;  %751 = vmatpush3.bf16.msra.mxu1 %v750_v1 }
 0x1ea   : > { %752 = vmatprep.subr.bf16.mxu1 %v1020_v49 }
 0x1eb   : > { %v753_v4 = vpack.c.bf16 %v500_v2, %v499_v3 }
 0x1ed   : > { %754 = vmatpush3.bf16.msra.mxu1 %v753_v4 }
 0x1f0   : > { %743 = vmatmul.mubr.msk.f32.vlgmr.msra.gmra.mrb[0].mxu1 %vm504_vm4, %v501_v5 }
 0x2c3   : > { %v574_v8 = vpop.f32.mrb[0].mxu1 }
 0x2c4   : > { %v575_v9 = vadd.f32 %v574_v8, %v503_v7  ;;  %v744_v10 = vpop.f32.mrb[1].mxu1 }
 0x2c6   : > { %580 = vperm.xlu0 %861, %v575_v9  }
 0x345   : > { %v581_v11 = vpop.permute.xlu0 %580 }
 0x346   : > { %583 = vst [vmem:[%s1209_s28] sm:$0x1] %v581_v11 }
 0x347 PF: > { %s707_s9 = sshll.u32 %s1002_s30, 4  ;;  %s597_s19 = sshll.u32 %s1209_s28, 4  ;;  %s598_s19 = int_to_ptr.vmem [resolvable:$true] %s597_s19 }
 0x348   : > { %s1254_s14 = scalar_lea.hbm %s1319_s6, %s707_s9  ;;  %s585_s15 = scalar_lea.sflag [#allocation6], %s306_s13 }
 0x349   : > { %s890_s11 = scalar_lea.vmem %s598_s19, 16  ;;  %s1024_s12 = smov [#allocation7]  }
 0x34a   : > { %p891_p8 = scmp.ne.s32.totalorder %s598_s19, %s890_s11  ;;  %s894_s21 = sshll.u32 %s1024_s12, 4  ;;  %s895_s21 = int_to_ptr.vmem [resolvable:$false] %s894_s21 }
 0x34b   : > { %s896_s17 = scalar_lea.vmem %s895_s21, 32  ;;  %p897_p11 = scmp.lt.s32.totalorder %s598_s19, %s895_s21 }
 0x34c   : > { %p892_p9 = pnand %p891_p8, %p1145_p12  ;;  %p898_p13 = scmp.lt.s32.totalorder %s896_s17, %s890_s11 }
 0x34e   : > { %p893_p10 = pneg %p892_p9  ;;  %p899_p0 = por %p898_p13, %p897_p11 }
 0x350   : > { %p900_p2 = pnand %p899_p0, %p893_p10 }
 0x352   : > { %903 = shalt.err (!%p900_p2)
}
 0x353   : > { %s904_s30 = scalar_lea.hbm %s1254_s14, 16  ;;  %s908_s22 = scalar_lea.hbm %s1319_s6, 32 }
 0x354   : > { %p905_p3 = scmp.ne.s32.totalorder %s1254_s14, %s904_s30  ;;  %p909_p1 = scmp.lt.u32.totalorder %s1254_s14, %s1319_s6 }
 0x355   : > { %p910_p6 = scmp.lt.u32.totalorder %s908_s22, %s904_s30  ;;  %p912_p8 = scmp.lt.u32.totalorder %s904_s30, %s1254_s14 }
 0x356   : > { %p906_p4 = pnand %p905_p3, %p1145_p12 }
 0x357   : > { %p911_p7 = por %p910_p6, %p909_p1 }
 0x358   : > { %p907_p5 = pneg %p906_p4 }
 0x359   : > { %p913_p9 = por %p912_p8, %p911_p7 }
 0x35b   : > { %p914_p10 = pnand %p913_p9, %p907_p5 }
 0x35d   : > { %917 = shalt.err (!%p914_p10)
}
 0x35e   : > { %760 = dma.vmem_to_hbm [thread:$0]  (%p1145_p12), %s598_s19, 16, %s1254_s14, %s585_s15  }
 0x35f PF: > { %p766_p11 = scmp.ge.s32.totalorder %s1014_s8, 2  ;;  %s609_s10 = sand.u32 1, %s974_s23  }
 0x360   : > { %p1334_p13 = scmp.ne.s32.totalorder %s1333_s26, 0  ;;  %s610_s9 = scalar_lea.sflag [#allocation6], %s609_s10 }
 0x362   : > { %p763_p0 = pnand %p766_p11, %p1334_p13 }
 0x364   : > { %967 = dma.done.wait (!%p763_p0), %s610_s9, 16  }
 0x365   : > { %969 = vsyncadd (!%p763_p0), %s610_s9, 4294967280  ;;  %s23_s8 = sadd.s32 1, %s1014_s8   ;;  %s1335_s16 = sld [smem:[#allocation14_spill]] }
 0x366   : > { %p20_p2 = scmp.ge.s32.totalorder %s23_s8, 14   ;;  %s1336_s20 = sld [smem:[#allocation10_spill]] }
 0x367   : > { %s1337_s28 = sld [smem:[#allocation15_spill]]  ;;  %s1338_s29 = sld [smem:[#allocation11_spill]] }
 0x368   : > { %s1339_s5 = sld [smem:[#allocation12_spill]]  ;;  %s1340_s18 = sld [smem:[#allocation13_spill]] }
 0x369   : > { %s1341_s23 = smov %s978_s24  ;;  %s1342_s24 = smov %s982_s25 }
 0x36a   : > { %s1344_s26 = smov %s990_s27  ;;  %s1346_s30 = smov %s1010_s7 }
 0x36b   : > { %s1343_s25 = smov %s1335_s16  ;;  %22 = sbr.rel (!%p20_p2) target bundleno = 11 (0xb), region = 100 }
 0x36c   : > { %s1345_s27 = smov %s1336_s20 }
 0x36e   : > { %s1347_s7 = smov %s1340_s18 }
 0x372   :  { %614 = vsyncpa [#allocation5], 1 }
 0x373   :  { %616 = vsyncpa [#allocation5 + $0x1], 1 }
 0x374   :  { %617 = vsyncpa [#allocation6], 1 }
 0x375   :  { %619 = vsyncpa [#allocation6 + $0x1], 1 }

</bundles_post_ra>
